<compile_context>
chip_gen: v6e
topology: v6e:2x2x1
jax: 0.10.0
libtpu: 0.0.40
codegen_flags: <defaults>
</compile_context>

<pallas_src>
import jax
import jax.numpy as jnp
from jax import lax
from jax.experimental import pallas as pl
from jax.experimental.pallas import tpu as pltpu


def mlp_kernel(x_ref, w1t_ref, b1_ref, w2_ref, b2_ref, o_ref):
    """Fused Linear -> ReLU -> Linear for one batch tile (batch on lanes).

    x_ref  : (TB, D) VMEM  -- batch tile (batch on sublanes, features on lanes)
    w1t_ref: (H, D)  VMEM  -- layer-1 weight (PyTorch layout), VMEM-resident
    b1_ref : (H, 1)  VMEM  -- layer-1 bias column, resident
    w2_ref : (H, 1)  VMEM  -- layer-2 weight column, resident
    b2_ref : (1,)    SMEM  -- layer-2 bias scalar
    o_ref  : (1, TB) VMEM  -- lane-dense logits row (batch on the lane axis)
    """
    # Layer 1 on the MXU, transposed so the result is (H, TB) with batch on
    # the lane axis.  NT dimension numbers == q @ k^T pattern: no explicit
    # data transpose is materialized.
    h_t = lax.dot_general(
        w1t_ref[...], x_ref[...],
        dimension_numbers=(((1,), (1,)), ((), ())),
        preferred_element_type=jnp.float32,
        precision=lax.Precision.HIGHEST,
    )                                                     # (H, TB)
    # Bias + ReLU on the VPU, fully-packed vregs.
    h_t = jnp.maximum(h_t + b1_ref[...], 0.0)
    # Layer 2: per-row dot product == VPU multiply + small sublane reduce over
    # H.  Result is already a lane-dense (1, TB) row -> unmasked store, no
    # sublane->lane relayout, no second MXU launch for an N=1 matmul.
    y = jnp.sum(h_t * w2_ref[...], axis=0, keepdims=True)  # (1, TB)
    o_ref[...] = (y + b2_ref[0]).astype(o_ref.dtype)


def simple_binary_classifier(x, w1, b1, w2, b2, *,
                             batch_tile=4096, min_pallas_batch=512):
    """Forward: Linear(D, H) -> ReLU -> Linear(H, 1). Returns [B, 1] logits."""
    B, D = x.shape
    H = w1.shape[1]

    # Small-batch fast path: one tiny tile; pallas_call custom-call overhead
    # exceeds any kernel-side saving and XLA fuses this 3-op MLP on its own.
    if B <= min_pallas_batch:
        h = jnp.maximum(
            jnp.dot(x, w1, precision=lax.Precision.HIGHEST) + b1.reshape(1, H),
            0.0)
        return (jnp.dot(h, w2.reshape(H, 1), precision=lax.Precision.HIGHEST)
                + b2.reshape(1, 1))

    # Tiny parameter reshapes/transposes (cheap, done once in XLA).
    w1t = jnp.transpose(w1)            # (H, D): PyTorch-native weight layout
    b1_col = b1.reshape(H, 1)
    w2_col = w2.reshape(H, 1)
    b2_s = b2.reshape(1)               # scalar bias -> SMEM

    # Batch tiling: one full-extent block for moderate B; otherwise a
    # lane-aligned tile (multiple of 128) with a cdiv grid.  Pallas masks the
    # ragged last block (rows are independent), so no XLA-side jnp.pad copy.
    if B <= batch_tile:
        TB = B
    else:
        assert batch_tile % 128 == 0, "batch_tile must be a multiple of 128"
        TB = batch_tile
    grid = (pl.cdiv(B, TB),)

    flops = 2 * B * D * H + 4 * B * H
    bytes_accessed = 4 * (B * D + H * D + 2 * H + 1 + B)

    out_row = pl.pallas_call(
        mlp_kernel,
        out_shape=jax.ShapeDtypeStruct((1, B), jnp.float32),
        grid_spec=pl.GridSpec(
            grid=grid,
            in_specs=[
                pl.BlockSpec((TB, D), lambda i: (i, 0)),         # x: batch-tiled
                pl.BlockSpec((H, D), lambda i: (0, 0)),          # w1^T: resident
                pl.BlockSpec((H, 1), lambda i: (0, 0)),          # b1: resident
                pl.BlockSpec((H, 1), lambda i: (0, 0)),          # w2: resident
                pl.BlockSpec(memory_space=pltpu.MemorySpace.SMEM),  # b2 scalar
            ],
            out_specs=pl.BlockSpec((1, TB), lambda i: (0, i)),   # lane-dense
        ),
        compiler_params=pltpu.CompilerParams(
            dimension_semantics=("parallel",),
        ),
        cost_estimate=pl.CostEstimate(
            flops=flops, transcendentals=0, bytes_accessed=bytes_accessed),
    )(x, w1t, b1_col, w2_col, b2_s)

    # (1, B) lane-dense slab -> (B, 1) logits (cheap: B floats).
    return out_row.reshape(B, 1)


def reference_forward(x, w1, b1, w2, b2):
    h = jnp.maximum(
        jnp.dot(x, w1, precision=lax.Precision.HIGHEST) + b1.reshape(1, -1), 0.0)
    return (jnp.dot(h, w2.reshape(-1, 1), precision=lax.Precision.HIGHEST)
            + b2.reshape(1, 1))


if __name__ == "__main__":
    input_size = 16
    hidden_size = 32
    batch = 8

    key = jax.random.PRNGKey(0)
    kx, k1, k2, k3, k4, kx2 = jax.random.split(key, 6)

    bound1 = 1.0 / jnp.sqrt(input_size)
    bound2 = 1.0 / jnp.sqrt(hidden_size)

    x = jax.random.normal(kx, (batch, input_size), dtype=jnp.float32)
    w1 = jax.random.uniform(k1, (input_size, hidden_size), jnp.float32, -bound1, bound1)
    b1 = jax.random.uniform(k2, (1, hidden_size), jnp.float32, -bound1, bound1)
    w2 = jax.random.uniform(k3, (hidden_size, 1), jnp.float32, -bound2, bound2)
    b2 = jax.random.uniform(k4, (1, 1), jnp.float32, -bound2, bound2)

    ref = reference_forward(x, w1, b1, w2, b2)

    # 1) Pallas kernel at the small shape (forced: single full-extent block).
    out = jax.block_until_ready(
        simple_binary_classifier(x, w1, b1, w2, b2, min_pallas_batch=0))
    assert out.shape == (batch, 1), out.shape
    assert jnp.allclose(out, ref, atol=2e-5, rtol=2e-5), "mismatch (pallas, small batch)"

    # 2) Default entry: small-batch fast path (plain fused XLA).
    out_fast = jax.block_until_ready(simple_binary_classifier(x, w1, b1, w2, b2))
    assert jnp.allclose(out_fast, ref, atol=2e-5, rtol=2e-5), "mismatch (fast path)"

    # 3) Batch-tiled Pallas path with a ragged last block (cdiv grid, masked store).
    big_batch = 1000
    xb = jax.random.normal(kx2, (big_batch, input_size), dtype=jnp.float32)
    out_b = jax.block_until_ready(
        simple_binary_classifier(xb, w1, b1, w2, b2,
                                 batch_tile=384, min_pallas_batch=0))
    ref_b = reference_forward(xb, w1, b1, w2, b2)
    assert out_b.shape == (big_batch, 1), out_b.shape
    assert jnp.allclose(out_b, ref_b, atol=2e-5, rtol=2e-5), "mismatch (pallas, tiled batch)"

    print("KERNEL_OK")
</pallas_src>

<mosaic_0001>
module attributes {stable_mosaic.version = 11 : i64} {
  func.func @mlp_kernel(%arg0: i32, %arg1: memref<8x16xf32, #tpu.memory_space<vmem>>, %arg2: memref<32x16xf32, #tpu.memory_space<vmem>>, %arg3: memref<32x1xf32, #tpu.memory_space<vmem>>, %arg4: memref<32x1xf32, #tpu.memory_space<vmem>>, %arg5: memref<1xf32, #tpu.memory_space<smem>>, %arg6: memref<1x8xf32, #tpu.memory_space<vmem>>) attributes {dimension_semantics = [#tpu.dimension_semantics<parallel>], iteration_bounds = array<i64: 1>, scalar_prefetch = 0 : i64, scratch_operands = 0 : i64, tpu.core_type = #tpu.core_type<tc>, window_params = [{transform_indices = @transform_0, window_bounds = array<i64: 8, 16>}, {pipeline_mode = #tpu.pipeline_mode<synchronous>, transform_indices = @transform_1, window_bounds = array<i64: 32, 16>}, {pipeline_mode = #tpu.pipeline_mode<synchronous>, transform_indices = @transform_2, window_bounds = array<i64: 32, 1>}, {pipeline_mode = #tpu.pipeline_mode<synchronous>, transform_indices = @transform_3, window_bounds = array<i64: 32, 1>}, {transform_indices = @transform_4, window_bounds = array<i64: 1>}, {transform_indices = @transform_5, window_bounds = array<i64: 1, 8>}]} {
    %c0 = arith.constant 0 : index
    %c0_0 = arith.constant 0 : index
    %0 = vector.load %arg2[%c0, %c0_0] : memref<32x16xf32, #tpu.memory_space<vmem>>, vector<32x16xf32>
    %c0_1 = arith.constant 0 : index
    %c0_2 = arith.constant 0 : index
    %1 = vector.load %arg1[%c0_1, %c0_2] : memref<8x16xf32, #tpu.memory_space<vmem>>, vector<8x16xf32>
    %cst = arith.constant dense<0.000000e+00> : vector<32x8xf32>
    %2 = tpu.matmul %0, %1, %cst {dimension_numbers = #tpu.dot_dimension_numbers<[1], [1], [0], [0], [0, 0, 1, 0], [], []>, precision = #tpu.contract_precision<fp32>} : vector<32x16xf32>, vector<8x16xf32>, vector<32x8xf32> -> vector<32x8xf32>
    %c0_3 = arith.constant 0 : index
    %c0_4 = arith.constant 0 : index
    %3 = vector.load %arg3[%c0_3, %c0_4] : memref<32x1xf32, #tpu.memory_space<vmem>>, vector<32x1xf32>
    %4 = vector.broadcast %3 : vector<32x1xf32> to vector<32x8xf32>
    %5 = arith.addf %2, %4 : vector<32x8xf32>
    %cst_5 = arith.constant 0.000000e+00 : f32
    %6 = vector.broadcast %cst_5 : f32 to vector<32x8xf32>
    %7 = arith.maximumf %5, %6 : vector<32x8xf32>
    %c0_6 = arith.constant 0 : index
    %c0_7 = arith.constant 0 : index
    %8 = vector.load %arg4[%c0_6, %c0_7] : memref<32x1xf32, #tpu.memory_space<vmem>>, vector<32x1xf32>
    %9 = vector.broadcast %8 : vector<32x1xf32> to vector<32x8xf32>
    %10 = arith.mulf %7, %9 : vector<32x8xf32>
    %cst_8 = arith.constant dense<0.000000e+00> : vector<8xf32>
    %11 = vector.multi_reduction <add>, %10, %cst_8 [0] : vector<32x8xf32> to vector<8xf32>
    %12 = vector.shape_cast %11 : vector<8xf32> to vector<1x8xf32>
    %c0_9 = arith.constant 0 : index
    %13 = memref.load %arg5[%c0_9] : memref<1xf32, #tpu.memory_space<smem>>
    %14 = vector.broadcast %13 : f32 to vector<1x8xf32>
    %15 = arith.addf %12, %14 : vector<1x8xf32>
    %c0_10 = arith.constant 0 : index
    %c0_11 = arith.constant 0 : index
    %16 = vector.load %arg6[%c0_10, %c0_11] : memref<1x8xf32, #tpu.memory_space<vmem>>, vector<1x8xf32>
    tpu.vector_store %arg6[%c0_10, %c0_11], %15 {strides = array<i32>} : memref<1x8xf32, #tpu.memory_space<vmem>>, vector<1x8xf32>,
    return
  }
  func.func @transform_0(%arg0: i32) -> (i32, i32) {
    %c0_i32 = arith.constant 0 : i32
    %c0_i32_0 = arith.constant 0 : i32
    return %arg0, %c0_i32 : i32, i32
  }
  func.func @transform_1(%arg0: i32) -> (i32, i32) {
    %c0_i32 = arith.constant 0 : i32
    %c0_i32_0 = arith.constant 0 : i32
    %c0_i32_1 = arith.constant 0 : i32
    return %c0_i32, %c0_i32_0 : i32, i32
  }
  func.func @transform_2(%arg0: i32) -> (i32, i32) {
    %c0_i32 = arith.constant 0 : i32
    %c0_i32_0 = arith.constant 0 : i32
    %c0_i32_1 = arith.constant 0 : i32
    return %c0_i32, %c0_i32_0 : i32, i32
  }
  func.func @transform_3(%arg0: i32) -> (i32, i32) {
    %c0_i32 = arith.constant 0 : i32
    %c0_i32_0 = arith.constant 0 : i32
    %c0_i32_1 = arith.constant 0 : i32
    return %c0_i32, %c0_i32_0 : i32, i32
  }
  func.func @transform_4(%arg0: i32) -> i32 {
    %c0_i32 = arith.constant 0 : i32
    %c0_i32_0 = arith.constant 0 : i32
    return %c0_i32 : i32
  }
  func.func @transform_5(%arg0: i32) -> (i32, i32) {
    %c0_i32 = arith.constant 0 : i32
    %c0_i32_0 = arith.constant 0 : i32
    return %c0_i32, %arg0 : i32, i32
  }
}

</mosaic_0001>

<bundles_post_ra>
// kernel: tpu_custom_call.1
= control target key start
LH: loop header
LB: loop body
LE: loop exit
PB: predicated region body
PF: predicated region fallthrough
CT: control target
= control target key end

     0   :  { %vm51_vm0 = vcmask 130048   ;;  %v811_v8 = vmov 0   ;;  %s920_s0 = inlined_call_operand.vmem [shape: f32[8,16], index: 0, kind: input, shape index: {}]   ;;  %s921_s1 = inlined_call_operand.vmem [shape: f32[32,16], index: 1, kind: input, shape index: {}]   ;;  %s922_s2 = inlined_call_operand.vmem [shape: f32[32,1], index: 2, kind: input, shape index: {}]   ;;  %s923_s3 = inlined_call_operand.vmem [shape: f32[32,1], index: 3, kind: input, shape index: {}]   ;;  %s924_s4 = inlined_call_operand.<no memory space> [shape: f32[1], index: 4, kind: input, shape index: {}]   ;;  %s925_s5 = inlined_call_operand.hbm [shape: f32[1,8], index: 5, kind: output, shape index: {}]  }
   0x1   :  { %v26_v0 = vld [vmem:[%s920_s0] sm:$0xff]  ;;  %v23_v2 = vld [vmem:[%s921_s1 + $0x8] sm:$0xff]  ;;  %v24_v6 = vld [vmem:[%s921_s1 + $0x10] sm:$0xff]  ;;  %787 = vset.pattern.permute.xlu0 %v811_v8  ;;  %788 = vset.pattern.permute.xlu1 %v811_v8 }
   0x2   :  { %v22_v1 = vld [vmem:[%s921_s1] sm:$0xff]  ;;  %v65_v3 = vsel %vm51_vm0, %v26_v0, 0  ;;  %v56_v5 = vsel %vm51_vm0, %v23_v2, 0  ;;  %v25_v7 = vld [vmem:[%s921_s1 + $0x18] sm:$0xff]  ;;  %v59_v13 = vsel %vm51_vm0, %v24_v6, 0  ;;  %v29_v14 = vld [vmem:[%s922_s2 + $0x10] sm:$0xff] }
   0x3   :  { %v53_v4 = vsel %vm51_vm0, %v22_v1, 0  ;;  %v27_v9 = vld [vmem:[%s922_s2] sm:$0xff]  ;;  %v864_v10 = vand.u32 4294901760, %v65_v3  ;;  %v868_v12 = vand.u32 4294901760, %v56_v5  ;;  %v874_v15 = vand.u32 4294901760, %v59_v13  ;;  %43 = vperm.xlu1 %788, %v29_v14   ;;  %v28_v17 = vld [vmem:[%s922_s2 + $0x8] sm:$0xff] }
   0x4   :  { %v866_v11 = vand.u32 4294901760, %v53_v4  ;;  %33 = vperm.xlu0 %787, %v27_v9   ;;  %v62_v16 = vsel %vm51_vm0, %v25_v7, 0  ;;  %v30_v22 = vld [vmem:[%s922_s2 + $0x18] sm:$0xff] }
   0x5   :  { %737 = vmatprep.subr.mxu0 %v864_v10  ;;  %v205_v19 = vsub.f32 %v65_v3, %v864_v10  ;;  %v144_v20 = vsub.f32 %v56_v5, %v868_v12  ;;  %v163_v21 = vand.u32 4294901760, %v62_v16 }
   0x6   :  { %v134_v18 = vsub.f32 %v53_v4, %v866_v11  ;;  %747 = vmatprep.mubr.f32.mxu1 %v866_v11 }
   0x7   :  { %11 = vsyncpa [#allocation4], 0  ;;  %738 = vmatpush3.xpose.msra.mxu0 %v864_v10  ;;  %v154_v23 = vsub.f32 %v59_v13, %v874_v15  ;;  %v206_v25 = vand.u32 4294901760, %v205_v19  ;;  %v145_v26 = vand.u32 4294901760, %v144_v20  ;;  %v164_v27 = vsub.f32 %v62_v16, %v163_v21  ;;  %48 = vperm.xlu1 %788, %v30_v22   ;;  %v646_v29 = vld [vmem:[%s923_s3] sm:$0xff]  ;;  %v647_v34 = vld [vmem:[%s923_s3 + $0x8] sm:$0xff] }
   0x8   :  { %v135_v24 = vand.u32 4294901760, %v134_v18  ;;  %753 = vmatprep.subr.mxu0 %v205_v19  ;;  %38 = vperm.xlu0 %787, %v28_v17   ;;  %v648_v42 = vld [vmem:[%s923_s3 + $0x10] sm:$0xff]  ;;  %v649_v43 = vld [vmem:[%s923_s3 + $0x18] sm:$0xff]  ;;  %vm674_vm1 = vcmask 64512   ;;  %s812_s17 = smov [#allocation3]   ;;  %vm691_vm2 = vcmask 57344  }
   0x9   :  { %v155_v28 = vand.u32 4294901760, %v154_v23  ;;  %v207_v31 = vsub.f32 %v205_v19, %v206_v25  ;;  %v146_v32 = vsub.f32 %v144_v20, %v145_v26  ;;  %v165_v33 = vand.u32 4294901760, %v164_v27  ;;  %s699_s18 = sshll.u32 %s812_s17, 4  ;;  %s700_s18 = int_to_ptr.vmem [resolvable:$true] %s699_s18 }
   0xa   :  { %v136_v30 = vsub.f32 %v134_v18, %v135_v24  ;;  %s789_s19 = scalar_lea.vmem %s700_s18, 16  ;;  %s793_s20 = scalar_lea.vmem %s700_s18, 32 }
   0xb   :  { %v156_v35 = vsub.f32 %v154_v23, %v155_v28  ;;  %v208_v37 = vand.u32 4294901760, %v207_v31  ;;  %v147_v38 = vand.u32 4294901760, %v146_v32  ;;  %v166_v39 = vsub.f32 %v164_v27, %v165_v33  ;;  %657 = vperm.xlu1 %788, %v647_v34   ;;  %p790_p0 = scmp.ne.s32.totalorder %s700_s18, %s789_s19  ;;  %p794_p1 = scmp.lt.s32.totalorder %s700_s18, %s700_s18 }
   0xc   :  { %v137_v36 = vand.u32 4294901760, %v136_v30  ;;  %652 = vperm.xlu0 %787, %v646_v29   ;;  %p795_p2 = scmp.lt.s32.totalorder %s793_s20, %s789_s19 }
   0xd   :  { %v157_v40 = vand.u32 4294901760, %v156_v35  ;;  %745 = vmatprep.subr.mxu1 %v208_v37  ;;  %v167_v41 = vand.u32 4294901760, %v166_v39 }
   0xe   :  { %739 = vmatprep.mubr.f32.mxu0 %v137_v36  ;;  %746 = vmatpush3.xpose.msra.mxu1 %v208_v37  ;;  %p796_p3 = por %p795_p2, %p794_p1 }
   0xf   :  { %740 = vmatmul.mubr.f32.vlgmr.msra.gmra.mxu0 %v147_v38  ;;  %761 = vmatprep.subr.mxu1 %v864_v10 }
  0x10   :  { %754 = vmatpush3.xpose.msra.mxu0 %v205_v19  ;;  %742 = vmatprep.mubr.f32.mxu0 %v157_v40  ;;  %p797_p4 = pnand %p796_p3, %p790_p0 }
  0x11   :  { %769 = vmatprep.subr.mxu0 %v206_v25  ;;  %748 = vmatmul.mubr.f32.vlgmr.msra.gmra.mxu1 %v868_v12 }
  0x12   :  { %662 = vperm.xlu0 %787, %v648_v42   ;;  %762 = vmatpush3.xpose.msra.mxu1 %v864_v10 }
  0x13   :  { %743 = vmatmul.mubr.f32.gmra.mxu0 %v167_v41  ;;  %750 = vmatprep.mubr.f32.mxu1 %v874_v15 }
  0x14   :  { %755 = vmatprep.mubr.f32.mxu0 %v134_v18  ;;  %777 = vmatprep.subr.mxu1 %v864_v10 }
  0x15   :  { %667 = vperm.xlu1 %788, %v649_v43   ;;  %751 = vmatmul.mubr.f32.gmra.mxu1 %v163_v21 }
  0x16   :  { %763 = vmatprep.mubr.f32.mxu1 %v135_v24 }
  0x17   :  { %756 = vmatmul.mubr.f32.vlgmr.msra.gmra.mxu0 %v144_v20 }
  0x18   :  { %770 = vmatpush3.xpose.msra.mxu0 %v206_v25  ;;  %758 = vmatprep.mubr.f32.mxu0 %v154_v23 }
  0x19   :  { %764 = vmatmul.mubr.f32.vlgmr.msra.gmra.mxu1 %v145_v26 }
  0x1a   :  { %778 = vmatpush3.xpose.msra.mxu1 %v864_v10  ;;  %766 = vmatprep.mubr.f32.mxu1 %v155_v28 }
  0x1b   :  { %759 = vmatmul.mubr.f32.gmra.mxu0 %v164_v27 }
  0x1c   :  { %771 = vmatprep.mubr.f32.mxu0 %v866_v11 }
  0x1d   :  { %767 = vmatmul.mubr.f32.gmra.mxu1 %v165_v33 }
  0x1e   :  { %779 = vmatprep.mubr.f32.mxu1 %v866_v11 }
  0x1f   :  { %772 = vmatmul.mubr.f32.vlgmr.msra.gmra.mxu0 %v868_v12 }
  0x20   :  { %774 = vmatprep.mubr.f32.mxu0 %v874_v15 }
  0x21   :  { %780 = vmatmul.mubr.f32.vlgmr.msra.gmra.mxu1 %v868_v12 }
  0x22   :  { %782 = vmatprep.mubr.f32.mxu1 %v874_v15 }
  0x23   :  { %775 = vmatmul.mubr.f32.gmra.mxu0 %v163_v21 }
  0x25   :  { %783 = vmatmul.mubr.f32.gmra.mxu1 %v163_v21 }
  0x7e   :  { %v44_v46 = vpop.permute.xlu1 %43 }
  0x7f   :  { %v34_v44 = vpop.permute.xlu0 %33 }
  0x82   :  { %v49_v53 = vpop.permute.xlu1 %48 }
  0x83   :  { %v39_v47 = vpop.permute.xlu0 %38 }
  0x86   :  { %v658_v29 = vpop.permute.xlu1 %657 }
  0x87   :  { %v653_v25 = vpop.permute.xlu0 %652 }
  0x8d   :  { %v663_v41 = vpop.permute.xlu0 %662 }
  0x90   :  { %v668_v42 = vpop.permute.xlu1 %667 }
  0xcf   :  { %v741_v45 = vpop.f32.mrf.mxu0 }
  0xd0   :  { %v150_v51 = vadd.f32 %v741_v45, %v39_v47 }
  0xd1   :  { %v139_v48 = vpop.f32.mrf.mxu0  ;;  %v749_v49 = vpop.f32.mrf.mxu1 }
  0xd2   :  { %v140_v55 = vadd.f32 %v139_v48, %v34_v44  ;;  %v252_v58 = vadd.f32 %v749_v49, %v150_v51 }
  0xd3   :  { %v744_v50 = vpop.f32.mrf.mxu0  ;;  %v245_v52 = vpop.f32.mrf.mxu1 }
  0xd4   :  { %v170_v59 = vadd.f32 %v744_v50, %v49_v53  ;;  %v246_v62 = vadd.f32 %v245_v52, %v140_v55 }
  0xd5   :  { %v159_v54 = vpop.f32.mrf.mxu0  ;;  %v752_v56 = vpop.f32.mrf.mxu1 }
  0xd6   :  { %v160_v63 = vadd.f32 %v159_v54, %v44_v46  ;;  %v264_v3 = vadd.f32 %v752_v56, %v170_v59  ;;  %v689_v56 = vstv %s924_s4 }
  0xd7   :  { %v757_v57 = vpop.f32.mrf.mxu0  ;;  %v257_v60 = vpop.f32.mrf.mxu1 }
  0xd8   :  { %v345_v0 = vadd.f32 %v757_v57, %v252_v58  ;;  %v258_v7 = vadd.f32 %v257_v60, %v160_v63 }
  0xd9   :  { %v337_v61 = vpop.f32.mrf.mxu0  ;;  %v765_v1 = vpop.f32.mrf.mxu1 }
  0xda   :  { %v338_v4 = vadd.f32 %v337_v61, %v246_v62  ;;  %v441_v8 = vadd.f32 %v765_v1, %v345_v0 }
  0xdb   :  { %v760_v2 = vpop.f32.mrf.mxu0  ;;  %v432_v5 = vpop.f32.mrf.mxu1 }
  0xdc   :  { %v359_v9 = vadd.f32 %v760_v2, %v264_v3  ;;  %v433_v12 = vadd.f32 %v432_v5, %v338_v4 }
  0xdd   :  { %v351_v6 = vpop.f32.mrf.mxu0  ;;  %v768_v10 = vpop.f32.mrf.mxu1 }
  0xde   :  { %v352_v13 = vadd.f32 %v351_v6, %v258_v7  ;;  %v457_v17 = vadd.f32 %v768_v10, %v359_v9 }
  0xdf   :  { %v773_v11 = vpop.f32.mrf.mxu0  ;;  %v448_v15 = vpop.f32.mrf.mxu1 }
  0xe0   :  { %v537_v14 = vadd.f32 %v773_v11, %v441_v8  ;;  %v449_v22 = vadd.f32 %v448_v15, %v352_v13 }
  0xe1   :  { %v530_v16 = vpop.f32.mrf.mxu0  ;;  %v781_v19 = vpop.f32.mrf.mxu1 }
  0xe2   :  { %v531_v18 = vadd.f32 %v530_v16, %v433_v12  ;;  %v627_v20 = vadd.f32 %v781_v19, %v537_v14 }
  0xe3   :  { %v776_v21 = vpop.f32.mrf.mxu0  ;;  %v620_v24 = vpop.f32.mrf.mxu1 }
  0xe4   :  { %v549_v23 = vadd.f32 %v776_v21, %v457_v17  ;;  %v643_v26 = vmax.f32 %v627_v20, 0.0  ;;  %v621_v27 = vadd.f32 %v620_v24, %v531_v18 }
  0xe5   :  { %v542_v28 = vpop.f32.mrf.mxu0  ;;  %v784_v31 = vpop.f32.mrf.mxu1 }
  0xe6   :  { %v543_v30 = vadd.f32 %v542_v28, %v449_v22  ;;  %v642_v32 = vmax.f32 %v621_v27, 0.0  ;;  %v639_v33 = vadd.f32 %v784_v31, %v549_v23  ;;  %v671_v35 = vmul.f32 %v658_v29, %v643_v26 }
  0xe7   :  { %v632_v34 = vpop.f32.mrf.mxu1 }
  0xe8   :  { %v670_v36 = vmul.f32 %v653_v25, %v642_v32  ;;  %v645_v37 = vmax.f32 %v639_v33, 0.0  ;;  %v633_v38 = vadd.f32 %v632_v34, %v543_v30  ;;  %v676_v43 = vsel %vm674_vm1, %v671_v35, 0.0 }
  0xea   :  { %v675_v39 = vsel %vm674_vm1, %v670_v36, 0.0  ;;  %v644_v40 = vmax.f32 %v633_v38, 0.0  ;;  %v673_v44 = vmul.f32 %v668_v42, %v645_v37 }
  0xeb   :  { %v677_v46 = vadd.f32 %v676_v43, %v675_v39 }
  0xec   :  { %v672_v45 = vmul.f32 %v663_v41, %v644_v40  ;;  %v680_v49 = vsel %vm674_vm1, %v673_v44, 0.0 }
  0xee   :  { %v678_v47 = vsel %vm674_vm1, %v672_v45, 0.0 }
  0xef   :  { %v679_v48 = vadd.f32 %v678_v47, %v677_v46 }
  0xf1   :  { %v681_v50 = vadd.f32 %v680_v49, %v679_v48 }
  0xf3   :  { %v682_v51 = vrot.slane %v681_v50, 4 }
  0xf5   :  { %v683_v52 = vadd.f32 %v682_v51, %v681_v50 }
  0xf7   :  { %v684_v53 = vrot.slane %v683_v52, 2 }
  0xf9   :  { %v685_v54 = vadd.f32 %v684_v53, %v683_v52 }
  0xfb   :  { %v686_v55 = vrot.slane %v685_v54, 1 }
  0xfd   :  { %v687_v57 = vadd.f32 %v686_v55, %v685_v54 }
  0xff   :  { %v690_v58 = vadd.f32 %v689_v56, %v687_v57 }
 0x101   :  { %692 = vst.msk [vmem:[#allocation3] sm:$0x1] %vm691_vm2, %v690_v58 }
 0x102   :  { %800 = shalt.err (!%p797_p4)
}
 0x103   :  { %702 = dma.vmem_to_hbm [thread:$0]  %s700_s18, 16, %s925_s5, [#allocation4]  }
 0x104   :  { %809 = dma.done.wait [#allocation4], 16  }
 0x105   :  { %810 = vsyncadd [#allocation4], 4294967280 }
 0x106   :  { %706 = vsyncpa [#allocation4], 1 }

</bundles_post_ra>
